<compile_context>
chip_gen: v6e
topology: v6e:2x2x1
jax: 0.10.0
libtpu: 0.0.40
codegen_flags: <defaults>
</compile_context>

<pallas_src>
from functools import partial

import jax
import jax.numpy as jnp
import numpy as np
from jax.experimental import pallas as pl
from jax.experimental.pallas import tpu as pltpu


def zca_eval_kernel(x_ref, sub_ref, b_ref, o_ref, *, groups, length):
    # x_ref:   (Nb, C, T)     Nb images x all channels x one lane tile
    # sub_ref: (G, L, L)      folded subspaces (resident: constant index_map)
    # b_ref:   (C, 1)         folded bias (f32)
    # o_ref:   (Nb, C, T)
    nb = x_ref.shape[0]
    for g in range(groups):                      # static unroll: zero-cost ref slices
        lo = g * length
        s_g = sub_ref[g]                         # (L, L)
        bias_g = b_ref[lo:lo + length, :]        # (L, 1)
        for b in range(nb):
            y = jnp.dot(s_g, x_ref[b, lo:lo + length, :],
                        preferred_element_type=jnp.float32)
            o_ref[b, lo:lo + length, :] = (y + bias_g).astype(o_ref.dtype)


def _choose_tiling(N, C, HW, itemsize):
    """Pick (Nb, hw_tile) so each x block is lane-dense and ~2-8 MiB."""
    target_bytes = 2 * 1024 * 1024
    max_block_bytes = 8 * 1024 * 1024

    # Lane tile: largest 128-multiple divisor of HW whose C-wide slab fits the
    # cap.  If HW is not 128-aligned, use the full HW extent (full-dim blocks
    # are always legal; tail-lane stores are masked).
    if HW % 128 == 0:
        q = HW // 128
        best = 1
        for d in range(1, q + 1):
            if q % d == 0 and 128 * d * C * itemsize <= max_block_bytes:
                best = d
        hw_tile = 128 * best
    else:
        hw_tile = HW  # TODO(synk): remainder tiling for non-128-aligned HW

    # Batch tile: smallest divisor of N that reaches the target block size,
    # otherwise the largest one under the cap (keeps the grid long for v7x
    # 2-TensorCore sharding while amortizing the ~0.35us per-step overhead).
    per_img = C * hw_tile * itemsize
    nb = 1
    for d in range(1, N + 1):
        if N % d != 0 or d * per_img > max_block_bytes:
            continue
        nb = d
        if d * per_img >= target_bytes:
            break
    return nb, hw_tile


@partial(jax.jit, static_argnames=("groups",))
def zca_norm_eval(x, running_subspace, running_mean, weight, bias, groups):
    """Eval-mode forward of ZCANormOrg.

    x:                (N, C, H, W)
    running_subspace: (G, L, L)  stacked per-group running_subspace{i} buffers
    running_mean:     (C, 1)
    weight, bias:     (C, 1)
    """
    N, C, H, W = x.shape
    G = groups
    assert C % G == 0
    L = C // G
    HW = H * W
    itemsize = jnp.dtype(x.dtype).itemsize

    # Fold affine + running mean into the matmul (tiny host-side work):
    #   w * (S @ (x - mu)) + b  ==  (w row-scaled S) @ x + (b - w * (S @ mu))
    w_g = weight.reshape(G, L, 1).astype(jnp.float32)
    b_g = bias.reshape(G, L, 1).astype(jnp.float32)
    mu_g = running_mean.reshape(G, L, 1).astype(jnp.float32)
    S = running_subspace.astype(jnp.float32)
    s_fold = w_g * S                                                  # (G, L, L)
    b_fold = (b_g - w_g * jnp.einsum('gij,gjk->gik', S, mu_g)).reshape(C, 1)

    # Sublane packing of the x/out dtype (f32: 8, bf16: 16, int8/fp8: 32).
    packing = {4: 8, 2: 16, 1: 32}[itemsize]
    if L % packing != 0:
        # In-kernel group slices would not be sublane aligned; fold the groups
        # into one block-diagonal (C, C) matrix and do a single matmul per
        # image instead (numerically identical).
        s_bd = jnp.zeros((C, C), dtype=jnp.float32)
        for g in range(G):
            s_bd = s_bd.at[g * L:(g + 1) * L, g * L:(g + 1) * L].set(s_fold[g])
        s_fold = s_bd[None]
        g_eff, l_eff = 1, C
    else:
        g_eff, l_eff = G, L

    # bf16 inputs take the native bf16 MXU path (accumulation stays f32).
    mm_dtype = jnp.bfloat16 if x.dtype == jnp.bfloat16 else jnp.float32
    s_fold = s_fold.astype(mm_dtype)

    x3d = x.reshape(N, C, HW)                 # free, contiguous view
    Nb, hw_tile = _choose_tiling(N, C, HW, itemsize)
    T = HW // hw_tile

    block_bytes = Nb * C * hw_tile * itemsize
    vmem_need = (4 * block_bytes                           # x + out, double-buffered
                 + 2 * s_fold.size * s_fold.dtype.itemsize
                 + 2 * C * 4
                 + (2 << 20))                              # headroom
    vmem_limit = int(min(max(vmem_need, 32 * 1024 * 1024), 56 * 1024 * 1024))

    kernel = partial(zca_eval_kernel, groups=g_eff, length=l_eff)

    out3d = pl.pallas_call(
        kernel,
        out_shape=jax.ShapeDtypeStruct((N, C, HW), x.dtype),
        grid_spec=pltpu.PrefetchScalarGridSpec(
            num_scalar_prefetch=0,
            grid=(N // Nb, T),
            in_specs=[
                # x slab: Nb images, all channel groups, one lane tile
                pl.BlockSpec((Nb, C, hw_tile), lambda n, t: (n, 0, t)),
                # folded subspaces: resident across the whole grid
                pl.BlockSpec((g_eff, l_eff, l_eff), lambda n, t: (0, 0, 0)),
                # folded bias: resident
                pl.BlockSpec((C, 1), lambda n, t: (0, 0)),
            ],
            out_specs=pl.BlockSpec((Nb, C, hw_tile), lambda n, t: (n, 0, t)),
        ),
        compiler_params=pltpu.CompilerParams(
            dimension_semantics=("parallel", "parallel"),
            vmem_limit_bytes=vmem_limit),
        cost_estimate=pl.CostEstimate(
            flops=2 * N * C * l_eff * HW,
            transcendentals=0,
            bytes_accessed=2 * N * C * HW * itemsize),
    )(x3d, s_fold, b_fold)

    return out3d.reshape(N, C, H, W)


def zca_norm_eval_ref(x, running_subspace, running_mean, weight, bias, groups):
    """Plain-JAX reference mirroring the PyTorch eval branch exactly."""
    N, C, H, W = x.shape
    G = groups
    L = C // G
    M = N * H * W
    x2d = jnp.transpose(x, (1, 0, 2, 3)).reshape(C, M).astype(jnp.float32)
    x2d = x2d - running_mean
    xg = x2d.reshape(G, L, M)
    y = jnp.einsum('gij,gjm->gim',
                   running_subspace.astype(jnp.float32), xg).reshape(C, M)
    y = y * weight + bias
    return jnp.transpose(y.reshape(C, N, H, W), (1, 0, 2, 3)).astype(x.dtype)


if __name__ == "__main__":
    def run_case(N, C, H, W, G, seed):
        L = C // G
        key = jax.random.PRNGKey(seed)
        kx, kw, km, ks = jax.random.split(key, 4)
        x = jax.random.normal(kx, (N, C, H, W), dtype=jnp.float32)
        # parameters / buffers (shapes from __init__); deterministic values:
        #   weight ~ uniform_(), bias = 0, running_mean = small values,
        #   running_subspace{i} = eye + small symmetric perturbation.
        weight = jax.random.uniform(kw, (C, 1), dtype=jnp.float32)
        bias = jnp.zeros((C, 1), dtype=jnp.float32)
        running_mean = 0.1 * jax.random.normal(km, (C, 1), dtype=jnp.float32)
        pert = 0.05 * jax.random.normal(ks, (G, L, L), dtype=jnp.float32)
        running_subspace = (jnp.eye(L, dtype=jnp.float32)[None, :, :]
                            + 0.5 * (pert + jnp.swapaxes(pert, 1, 2)))

        out = jax.block_until_ready(
            zca_norm_eval(x, running_subspace, running_mean, weight, bias, G))
        ref = jax.block_until_ready(
            zca_norm_eval_ref(x, running_subspace, running_mean, weight, bias, G))
        assert out.shape == (N, C, H, W)
        np.testing.assert_allclose(np.asarray(out), np.asarray(ref),
                                   rtol=1e-5, atol=1e-5)

    # Primary: lane-dense path (HW % 128 == 0), fused groups, Nb batching.
    run_case(N=2, C=32, H=16, W=16, G=4, seed=0)
    # Fallback: L=4 (< f32 sublane) + non-128-aligned HW -> block-diag path.
    run_case(N=2, C=16, H=7, W=7, G=4, seed=1)

    print("KERNEL_OK")
</pallas_src>

<mosaic_0001>
module attributes {stable_mosaic.version = 11 : i64} {
  func.func @zca_eval_kernel(%arg0: i32, %arg1: i32, %arg2: memref<2x32x256xf32, #tpu.memory_space<vmem>>, %arg3: memref<4x8x8xf32, #tpu.memory_space<vmem>>, %arg4: memref<32x1xf32, #tpu.memory_space<vmem>>, %arg5: memref<2x32x256xf32, #tpu.memory_space<vmem>>) attributes {dimension_semantics = [#tpu.dimension_semantics<parallel>, #tpu.dimension_semantics<parallel>], iteration_bounds = array<i64: 1, 1>, scalar_prefetch = 0 : i64, scratch_operands = 0 : i64, tpu.core_type = #tpu.core_type<tc>, window_params = [{transform_indices = @transform_0, window_bounds = array<i64: 2, 32, 256>}, {pipeline_mode = #tpu.pipeline_mode<synchronous>, transform_indices = @transform_1, window_bounds = array<i64: 4, 8, 8>}, {pipeline_mode = #tpu.pipeline_mode<synchronous>, transform_indices = @transform_2, window_bounds = array<i64: 32, 1>}, {transform_indices = @transform_3, window_bounds = array<i64: 2, 32, 256>}]} {
    %c0 = arith.constant 0 : index
    %c0_0 = arith.constant 0 : index
    %c0_1 = arith.constant 0 : index
    %0 = vector.load %arg3[%c0, %c0_0, %c0_1] : memref<4x8x8xf32, #tpu.memory_space<vmem>>, vector<1x8x8xf32>
    %1 = vector.shape_cast %0 : vector<1x8x8xf32> to vector<8x8xf32>
    %c0_2 = arith.constant 0 : index
    %c0_3 = arith.constant 0 : index
    %2 = vector.load %arg4[%c0_2, %c0_3] : memref<32x1xf32, #tpu.memory_space<vmem>>, vector<8x1xf32>
    %c0_4 = arith.constant 0 : index
    %c0_5 = arith.constant 0 : index
    %c0_6 = arith.constant 0 : index
    %3 = vector.load %arg2[%c0_4, %c0_5, %c0_6] : memref<2x32x256xf32, #tpu.memory_space<vmem>>, vector<1x8x256xf32>
    %4 = vector.shape_cast %3 : vector<1x8x256xf32> to vector<8x256xf32>
    %cst = arith.constant dense<0.000000e+00> : vector<8x256xf32>
    %5 = tpu.matmul %1, %4, %cst {dimension_numbers = #tpu.dot_dimension_numbers<[1], [0], [0], [1], [0, 0, 1, 1], [], []>} : vector<8x8xf32>, vector<8x256xf32>, vector<8x256xf32> -> vector<8x256xf32>
    %6 = vector.broadcast %2 : vector<8x1xf32> to vector<8x256xf32>
    %7 = arith.addf %5, %6 : vector<8x256xf32>
    %c0_7 = arith.constant 0 : index
    %c0_8 = arith.constant 0 : index
    %c0_9 = arith.constant 0 : index
    %8 = vector.load %arg5[%c0_7, %c0_8, %c0_9] : memref<2x32x256xf32, #tpu.memory_space<vmem>>, vector<1x8x256xf32>
    %9 = vector.shape_cast %8 : vector<1x8x256xf32> to vector<8x256xf32>
    %10 = vector.shape_cast %7 : vector<8x256xf32> to vector<1x8x256xf32>
    tpu.vector_store %arg5[%c0_7, %c0_8, %c0_9], %10 {strides = array<i32>} : memref<2x32x256xf32, #tpu.memory_space<vmem>>, vector<1x8x256xf32>,
    %c1 = arith.constant 1 : index
    %c0_10 = arith.constant 0 : index
    %c0_11 = arith.constant 0 : index
    %11 = vector.load %arg2[%c1, %c0_10, %c0_11] : memref<2x32x256xf32, #tpu.memory_space<vmem>>, vector<1x8x256xf32>
    %12 = vector.shape_cast %11 : vector<1x8x256xf32> to vector<8x256xf32>
    %cst_12 = arith.constant dense<0.000000e+00> : vector<8x256xf32>
    %13 = tpu.matmul %1, %12, %cst_12 {dimension_numbers = #tpu.dot_dimension_numbers<[1], [0], [0], [1], [0, 0, 1, 1], [], []>} : vector<8x8xf32>, vector<8x256xf32>, vector<8x256xf32> -> vector<8x256xf32>
    %14 = vector.broadcast %2 : vector<8x1xf32> to vector<8x256xf32>
    %15 = arith.addf %13, %14 : vector<8x256xf32>
    %c1_13 = arith.constant 1 : index
    %c0_14 = arith.constant 0 : index
    %c0_15 = arith.constant 0 : index
    %16 = vector.load %arg5[%c1_13, %c0_14, %c0_15] : memref<2x32x256xf32, #tpu.memory_space<vmem>>, vector<1x8x256xf32>
    %17 = vector.shape_cast %16 : vector<1x8x256xf32> to vector<8x256xf32>
    %18 = vector.shape_cast %15 : vector<8x256xf32> to vector<1x8x256xf32>
    tpu.vector_store %arg5[%c1_13, %c0_14, %c0_15], %18 {strides = array<i32>} : memref<2x32x256xf32, #tpu.memory_space<vmem>>, vector<1x8x256xf32>,
    %c1_16 = arith.constant 1 : index
    %c0_17 = arith.constant 0 : index
    %c0_18 = arith.constant 0 : index
    %19 = vector.load %arg3[%c1_16, %c0_17, %c0_18] : memref<4x8x8xf32, #tpu.memory_space<vmem>>, vector<1x8x8xf32>
    %20 = vector.shape_cast %19 : vector<1x8x8xf32> to vector<8x8xf32>
    %c8 = arith.constant 8 : index
    %c0_19 = arith.constant 0 : index
    %21 = vector.load %arg4[%c8, %c0_19] : memref<32x1xf32, #tpu.memory_space<vmem>>, vector<8x1xf32>
    %c0_20 = arith.constant 0 : index
    %c8_21 = arith.constant 8 : index
    %c0_22 = arith.constant 0 : index
    %22 = vector.load %arg2[%c0_20, %c8_21, %c0_22] : memref<2x32x256xf32, #tpu.memory_space<vmem>>, vector<1x8x256xf32>
    %23 = vector.shape_cast %22 : vector<1x8x256xf32> to vector<8x256xf32>
    %cst_23 = arith.constant dense<0.000000e+00> : vector<8x256xf32>
    %24 = tpu.matmul %20, %23, %cst_23 {dimension_numbers = #tpu.dot_dimension_numbers<[1], [0], [0], [1], [0, 0, 1, 1], [], []>} : vector<8x8xf32>, vector<8x256xf32>, vector<8x256xf32> -> vector<8x256xf32>
    %25 = vector.broadcast %21 : vector<8x1xf32> to vector<8x256xf32>
    %26 = arith.addf %24, %25 : vector<8x256xf32>
    %c0_24 = arith.constant 0 : index
    %c8_25 = arith.constant 8 : index
    %c0_26 = arith.constant 0 : index
    %27 = vector.load %arg5[%c0_24, %c8_25, %c0_26] : memref<2x32x256xf32, #tpu.memory_space<vmem>>, vector<1x8x256xf32>
    %28 = vector.shape_cast %27 : vector<1x8x256xf32> to vector<8x256xf32>
    %29 = vector.shape_cast %26 : vector<8x256xf32> to vector<1x8x256xf32>
    tpu.vector_store %arg5[%c0_24, %c8_25, %c0_26], %29 {strides = array<i32>} : memref<2x32x256xf32, #tpu.memory_space<vmem>>, vector<1x8x256xf32>,
    %c1_27 = arith.constant 1 : index
    %c8_28 = arith.constant 8 : index
    %c0_29 = arith.constant 0 : index
    %30 = vector.load %arg2[%c1_27, %c8_28, %c0_29] : memref<2x32x256xf32, #tpu.memory_space<vmem>>, vector<1x8x256xf32>
    %31 = vector.shape_cast %30 : vector<1x8x256xf32> to vector<8x256xf32>
    %cst_30 = arith.constant dense<0.000000e+00> : vector<8x256xf32>
    %32 = tpu.matmul %20, %31, %cst_30 {dimension_numbers = #tpu.dot_dimension_numbers<[1], [0], [0], [1], [0, 0, 1, 1], [], []>} : vector<8x8xf32>, vector<8x256xf32>, vector<8x256xf32> -> vector<8x256xf32>
    %33 = vector.broadcast %21 : vector<8x1xf32> to vector<8x256xf32>
    %34 = arith.addf %32, %33 : vector<8x256xf32>
    %c1_31 = arith.constant 1 : index
    %c8_32 = arith.constant 8 : index
    %c0_33 = arith.constant 0 : index
    %35 = vector.load %arg5[%c1_31, %c8_32, %c0_33] : memref<2x32x256xf32, #tpu.memory_space<vmem>>, vector<1x8x256xf32>
    %36 = vector.shape_cast %35 : vector<1x8x256xf32> to vector<8x256xf32>
    %37 = vector.shape_cast %34 : vector<8x256xf32> to vector<1x8x256xf32>
    tpu.vector_store %arg5[%c1_31, %c8_32, %c0_33], %37 {strides = array<i32>} : memref<2x32x256xf32, #tpu.memory_space<vmem>>, vector<1x8x256xf32>,
    %c2 = arith.constant 2 : index
    %c0_34 = arith.constant 0 : index
    %c0_35 = arith.constant 0 : index
    %38 = vector.load %arg3[%c2, %c0_34, %c0_35] : memref<4x8x8xf32, #tpu.memory_space<vmem>>, vector<1x8x8xf32>
    %39 = vector.shape_cast %38 : vector<1x8x8xf32> to vector<8x8xf32>
    %c16 = arith.constant 16 : index
    %c0_36 = arith.constant 0 : index
    %40 = vector.load %arg4[%c16, %c0_36] : memref<32x1xf32, #tpu.memory_space<vmem>>, vector<8x1xf32>
    %c0_37 = arith.constant 0 : index
    %c16_38 = arith.constant 16 : index
    %c0_39 = arith.constant 0 : index
    %41 = vector.load %arg2[%c0_37, %c16_38, %c0_39] : memref<2x32x256xf32, #tpu.memory_space<vmem>>, vector<1x8x256xf32>
    %42 = vector.shape_cast %41 : vector<1x8x256xf32> to vector<8x256xf32>
    %cst_40 = arith.constant dense<0.000000e+00> : vector<8x256xf32>
    %43 = tpu.matmul %39, %42, %cst_40 {dimension_numbers = #tpu.dot_dimension_numbers<[1], [0], [0], [1], [0, 0, 1, 1], [], []>} : vector<8x8xf32>, vector<8x256xf32>, vector<8x256xf32> -> vector<8x256xf32>
    %44 = vector.broadcast %40 : vector<8x1xf32> to vector<8x256xf32>
    %45 = arith.addf %43, %44 : vector<8x256xf32>
    %c0_41 = arith.constant 0 : index
    %c16_42 = arith.constant 16 : index
    %c0_43 = arith.constant 0 : index
    %46 = vector.load %arg5[%c0_41, %c16_42, %c0_43] : memref<2x32x256xf32, #tpu.memory_space<vmem>>, vector<1x8x256xf32>
    %47 = vector.shape_cast %46 : vector<1x8x256xf32> to vector<8x256xf32>
    %48 = vector.shape_cast %45 : vector<8x256xf32> to vector<1x8x256xf32>
    tpu.vector_store %arg5[%c0_41, %c16_42, %c0_43], %48 {strides = array<i32>} : memref<2x32x256xf32, #tpu.memory_space<vmem>>, vector<1x8x256xf32>,
    %c1_44 = arith.constant 1 : index
    %c16_45 = arith.constant 16 : index
    %c0_46 = arith.constant 0 : index
    %49 = vector.load %arg2[%c1_44, %c16_45, %c0_46] : memref<2x32x256xf32, #tpu.memory_space<vmem>>, vector<1x8x256xf32>
    %50 = vector.shape_cast %49 : vector<1x8x256xf32> to vector<8x256xf32>
    %cst_47 = arith.constant dense<0.000000e+00> : vector<8x256xf32>
    %51 = tpu.matmul %39, %50, %cst_47 {dimension_numbers = #tpu.dot_dimension_numbers<[1], [0], [0], [1], [0, 0, 1, 1], [], []>} : vector<8x8xf32>, vector<8x256xf32>, vector<8x256xf32> -> vector<8x256xf32>
    %52 = vector.broadcast %40 : vector<8x1xf32> to vector<8x256xf32>
    %53 = arith.addf %51, %52 : vector<8x256xf32>
    %c1_48 = arith.constant 1 : index
    %c16_49 = arith.constant 16 : index
    %c0_50 = arith.constant 0 : index
    %54 = vector.load %arg5[%c1_48, %c16_49, %c0_50] : memref<2x32x256xf32, #tpu.memory_space<vmem>>, vector<1x8x256xf32>
    %55 = vector.shape_cast %54 : vector<1x8x256xf32> to vector<8x256xf32>
    %56 = vector.shape_cast %53 : vector<8x256xf32> to vector<1x8x256xf32>
    tpu.vector_store %arg5[%c1_48, %c16_49, %c0_50], %56 {strides = array<i32>} : memref<2x32x256xf32, #tpu.memory_space<vmem>>, vector<1x8x256xf32>,
    %c3 = arith.constant 3 : index
    %c0_51 = arith.constant 0 : index
    %c0_52 = arith.constant 0 : index
    %57 = vector.load %arg3[%c3, %c0_51, %c0_52] : memref<4x8x8xf32, #tpu.memory_space<vmem>>, vector<1x8x8xf32>
    %58 = vector.shape_cast %57 : vector<1x8x8xf32> to vector<8x8xf32>
    %c24 = arith.constant 24 : index
    %c0_53 = arith.constant 0 : index
    %59 = vector.load %arg4[%c24, %c0_53] : memref<32x1xf32, #tpu.memory_space<vmem>>, vector<8x1xf32>
    %c0_54 = arith.constant 0 : index
    %c24_55 = arith.constant 24 : index
    %c0_56 = arith.constant 0 : index
    %60 = vector.load %arg2[%c0_54, %c24_55, %c0_56] : memref<2x32x256xf32, #tpu.memory_space<vmem>>, vector<1x8x256xf32>
    %61 = vector.shape_cast %60 : vector<1x8x256xf32> to vector<8x256xf32>
    %cst_57 = arith.constant dense<0.000000e+00> : vector<8x256xf32>
    %62 = tpu.matmul %58, %61, %cst_57 {dimension_numbers = #tpu.dot_dimension_numbers<[1], [0], [0], [1], [0, 0, 1, 1], [], []>} : vector<8x8xf32>, vector<8x256xf32>, vector<8x256xf32> -> vector<8x256xf32>
    %63 = vector.broadcast %59 : vector<8x1xf32> to vector<8x256xf32>
    %64 = arith.addf %62, %63 : vector<8x256xf32>
    %c0_58 = arith.constant 0 : index
    %c24_59 = arith.constant 24 : index
    %c0_60 = arith.constant 0 : index
    %65 = vector.load %arg5[%c0_58, %c24_59, %c0_60] : memref<2x32x256xf32, #tpu.memory_space<vmem>>, vector<1x8x256xf32>
    %66 = vector.shape_cast %65 : vector<1x8x256xf32> to vector<8x256xf32>
    %67 = vector.shape_cast %64 : vector<8x256xf32> to vector<1x8x256xf32>
    tpu.vector_store %arg5[%c0_58, %c24_59, %c0_60], %67 {strides = array<i32>} : memref<2x32x256xf32, #tpu.memory_space<vmem>>, vector<1x8x256xf32>,
    %c1_61 = arith.constant 1 : index
    %c24_62 = arith.constant 24 : index
    %c0_63 = arith.constant 0 : index
    %68 = vector.load %arg2[%c1_61, %c24_62, %c0_63] : memref<2x32x256xf32, #tpu.memory_space<vmem>>, vector<1x8x256xf32>
    %69 = vector.shape_cast %68 : vector<1x8x256xf32> to vector<8x256xf32>
    %cst_64 = arith.constant dense<0.000000e+00> : vector<8x256xf32>
    %70 = tpu.matmul %58, %69, %cst_64 {dimension_numbers = #tpu.dot_dimension_numbers<[1], [0], [0], [1], [0, 0, 1, 1], [], []>} : vector<8x8xf32>, vector<8x256xf32>, vector<8x256xf32> -> vector<8x256xf32>
    %71 = vector.broadcast %59 : vector<8x1xf32> to vector<8x256xf32>
    %72 = arith.addf %70, %71 : vector<8x256xf32>
    %c1_65 = arith.constant 1 : index
    %c24_66 = arith.constant 24 : index
    %c0_67 = arith.constant 0 : index
    %73 = vector.load %arg5[%c1_65, %c24_66, %c0_67] : memref<2x32x256xf32, #tpu.memory_space<vmem>>, vector<1x8x256xf32>
    %74 = vector.shape_cast %73 : vector<1x8x256xf32> to vector<8x256xf32>
    %75 = vector.shape_cast %72 : vector<8x256xf32> to vector<1x8x256xf32>
    tpu.vector_store %arg5[%c1_65, %c24_66, %c0_67], %75 {strides = array<i32>} : memref<2x32x256xf32, #tpu.memory_space<vmem>>, vector<1x8x256xf32>,
    return
  }
  func.func @transform_0(%arg0: i32, %arg1: i32) -> (i32, i32, i32) {
    %c0_i32 = arith.constant 0 : i32
    %c0_i32_0 = arith.constant 0 : i32
    return %arg0, %c0_i32, %arg1 : i32, i32, i32
  }
  func.func @transform_1(%arg0: i32, %arg1: i32) -> (i32, i32, i32) {
    %c0_i32 = arith.constant 0 : i32
    %c0_i32_0 = arith.constant 0 : i32
    %c0_i32_1 = arith.constant 0 : i32
    %c0_i32_2 = arith.constant 0 : i32
    return %c0_i32, %c0_i32_0, %c0_i32_1 : i32, i32, i32
  }
  func.func @transform_2(%arg0: i32, %arg1: i32) -> (i32, i32) {
    %c0_i32 = arith.constant 0 : i32
    %c0_i32_0 = arith.constant 0 : i32
    %c0_i32_1 = arith.constant 0 : i32
    return %c0_i32, %c0_i32_0 : i32, i32
  }
  func.func @transform_3(%arg0: i32, %arg1: i32) -> (i32, i32, i32) {
    %c0_i32 = arith.constant 0 : i32
    %c0_i32_0 = arith.constant 0 : i32
    return %arg0, %c0_i32, %arg1 : i32, i32, i32
  }
}

</mosaic_0001>

<bundles_post_ra>
// kernel: mul.6
= control target key start
LH: loop header
LB: loop body
LE: loop exit
PB: predicated region body
PF: predicated region fallthrough
CT: control target
= control target key end

     0   :  { %s40_s8 = smov 104   ;;  %vm8_vm0 = vcmask 64512   ;;  %s41_s9 = smov 112   ;;  %s58_s0 = inlined_call_operand.vmem [shape: f32[32], index: 0, kind: input, shape index: {}]   ;;  %s59_s1 = inlined_call_operand.vmem [shape: f32[4,8], index: 1, kind: output, shape index: {}]  }
   0x1   :  { %v5_v0 = vld [vmem:[%s58_s0] sm:$0x1]  ;;  %s39_s0 = smov 120  }
   0x2   :  { %6 = vst [vmem:[#allocation1] sm:$0x1] %v5_v0 }
   0x9   :  { %v10_v1 = vld [vmem:[#allocation1] sm:$0x1]  }
   0xa   :  { %v22_v2 = vld [vmem:[#allocation1] sm:$0x1]   ;;  %11 = vrot.lane.b32.xlu0 %v10_v1, %s39_s0 }
   0xb   :  { %23 = vrot.lane.b32.xlu1 %v22_v2, %s40_s8  ;;  %v7_v3 = vld [vmem:[#allocation1] sm:$0x1]  }
   0xc   :  { %v16_v4 = vld [vmem:[#allocation1] sm:$0x1]   ;;  %9 = vst.msk [vmem:[#allocation0] sm:$0x1] %vm8_vm0, %v7_v3  }
   0xe   :  { %17 = vrot.lane.b32.xlu0 %v16_v4, %s41_s9 }
  0x7c   :  { %v12_v5 = vpop.permute.xlu0 %11  }
  0x7d   :  { %v24_v6 = vpop.permute.xlu1 %23   ;;  %15 = vst.msk [vmem:[#allocation0 + $0x1] sm:$0x1] %vm8_vm0, %v12_v5  }
  0x7e   :  { %27 = vst.msk [vmem:[#allocation0 + $0x3] sm:$0x1] %vm8_vm0, %v24_v6  }
  0x80   :  { %v18_v7 = vpop.permute.xlu0 %17  }
  0x81   :  { %21 = vst.msk [vmem:[#allocation0 + $0x2] sm:$0x1] %vm8_vm0, %v18_v7  }
  0x88   :  { %v32_v8 = vld [vmem:[#allocation0] sm:$0xf] }
  0x89   :  { %35 = vst [vmem:[%s59_s1] sm:$0xf] %v32_v8 }

// kernel: sub.2
= control target key start
LH: loop header
LB: loop body
LE: loop exit
PB: predicated region body
PF: predicated region fallthrough
CT: control target
= control target key end

     0   :  { %s100_s0 = inlined_call_operand.vmem [shape: f32[32,1], index: 0, kind: input, shape index: {}]   ;;  %s101_s1 = inlined_call_operand.vmem [shape: f32[32,1], index: 1, kind: input, shape index: {}]   ;;  %s102_s2 = inlined_call_operand.vmem [shape: f32[32,1], index: 2, kind: output, shape index: {}]  }
   0x1   :  { %v3_v0 = vld [vmem:[%s100_s0] sm:$0xff]  ;;  %v40_v2 = vld [vmem:[%s100_s0 + $0x8] sm:$0xff]  ;;  %v43_v5 = vld [vmem:[%s100_s0 + $0x10] sm:$0xff] }
   0x2   :  { %v4_v1 = vld [vmem:[%s101_s1] sm:$0xff]  ;;  %v41_v4 = vld [vmem:[%s101_s1 + $0x8] sm:$0xff]  ;;  %v44_v6 = vld [vmem:[%s101_s1 + $0x10] sm:$0xff] }
   0x3   :  { %v7_v3 = vsub.f32 %v3_v0, %v4_v1  ;;  %v16_v7 = vsub.f32 %v40_v2, %v41_v4  ;;  %v26_v8 = vsub.f32 %v43_v5, %v44_v6  ;;  %v46_v9 = vld [vmem:[%s100_s0 + $0x18] sm:$0xff] }
   0x4   :  { %v47_v10 = vld [vmem:[%s101_s1 + $0x18] sm:$0xff] }
   0x5   :  { %9 = vst [vmem:[%s102_s2] sm:$0xff] %v7_v3  ;;  %v36_v11 = vsub.f32 %v46_v9, %v47_v10  ;;  %42 = vst [vmem:[%s102_s2 + $0x8] sm:$0xff] %v16_v7 }
   0x6   :  { %45 = vst [vmem:[%s102_s2 + $0x10] sm:$0xff] %v26_v8 }
   0x7   :  { %48 = vst [vmem:[%s102_s2 + $0x18] sm:$0xff] %v36_v11 }

// kernel: mul.1
= control target key start
LH: loop header
LB: loop body
LE: loop exit
PB: predicated region body
PF: predicated region fallthrough
CT: control target
= control target key end

     0   :  { %s34_s0 = inlined_call_operand.vmem [shape: f32[32,1], index: 0, kind: input, shape index: {}]   ;;  %s35_s1 = inlined_call_operand.vmem [shape: f32[32,1], index: 1, kind: input, shape index: {}]   ;;  %s36_s2 = inlined_call_operand.vmem [shape: f32[32,1], index: 2, kind: output, shape index: {}]  }
   0x1   :  { %v3_v0 = vld [vmem:[%s34_s0] sm:$0x1] }
   0x2   :  { %v4_v1 = vld [vmem:[%s35_s1] sm:$0x1] }
   0x3   :  { %v7_v2 = vmul.f32 %v4_v1, %v3_v0 }
   0x5   :  { %9 = vst [vmem:[%s36_s2] sm:$0x1] %v7_v2 }

// kernel: zca_norm_eval.1
= control target key start
LH: loop header
LB: loop body
LE: loop exit
PB: predicated region body
PF: predicated region fallthrough
CT: control target
= control target key end

     0   :  { %v695_v3 = vmov 0.0   ;;  %vm23_vm0 = vcmask 64512   ;;  %v696_v23 = vmov 0   ;;  %s845_s0 = inlined_call_operand.vmem [shape: f32[2,32,256], index: 0, kind: input, shape index: {}]   ;;  %s846_s1 = inlined_call_operand.vmem [shape: f32[4,8,8], index: 1, kind: input, shape index: {}]   ;;  %s847_s2 = inlined_call_operand.vmem [shape: f32[32,1], index: 2, kind: input, shape index: {}]   ;;  %s848_s3 = inlined_call_operand.vmem [shape: f32[2,32,256], index: 3, kind: output, shape index: {}]  }
   0x1   :  { %v17_v0 = vld [vmem:[%s845_s0 + $0x8] sm:$0xff]  ;;  %v16_v2 = vld [vmem:[%s845_s0] sm:$0xff]  ;;  %91 = vmatprep.mubr.f32.mxu0 %v695_v3  ;;  %167 = vmatprep.mubr.f32.mxu1 %v695_v3  ;;  %v181_v6 = vld [vmem:[%s845_s0 + $0x18] sm:$0xff] }
   0x2   :  { %v666_v1 = vld [vmem:[%s845_s0 + $0x48] sm:$0xff]  ;;  %57 = vmatprep.subr.mxu0 %v17_v0  ;;  %v665_v4 = vld [vmem:[%s845_s0 + $0x40] sm:$0xff]  ;;  %v673_v7 = vld [vmem:[%s845_s0 + $0x58] sm:$0xff]  ;;  %693 = vset.pattern.permute.xlu0 %v696_v23 }
   0x3   :  { %133 = vmatprep.subr.mxu1 %v666_v1  ;;  %v14_v5 = vld [vmem:[%s846_s1] sm:$0xff]  ;;  %58 = vmatpush1.msra.mxu0 %v16_v2  ;;  %v180_v8 = vld [vmem:[%s845_s0 + $0x10] sm:$0xff]  ;;  %v670_v10 = vld [vmem:[%s846_s1 + $0x8] sm:$0xff] }
   0x4   :  { %134 = vmatpush1.msra.mxu1 %v665_v4  ;;  %v672_v9 = vld [vmem:[%s845_s0 + $0x50] sm:$0xff]  ;;  %664 = vmatmul.mubr.msk.f32.vlgmr.msra.gmra.mxu0 %vm23_vm0, %v14_v5  ;;  %v342_v11 = vld [vmem:[%s845_s0 + $0x28] sm:$0xff]  ;;  %v341_v13 = vld [vmem:[%s845_s0 + $0x20] sm:$0xff] }
   0x5   :  { %667 = vmatmul.mubr.msk.f32.vlgmr.msra.gmra.mxu1 %vm23_vm0, %v14_v5  ;;  %220 = vmatprep.subr.mxu0 %v181_v6  ;;  %v680_v12 = vld [vmem:[%s845_s0 + $0x68] sm:$0xff]  ;;  %v679_v14 = vld [vmem:[%s845_s0 + $0x60] sm:$0xff]  ;;  %v677_v15 = vld [vmem:[%s846_s1 + $0x10] sm:$0xff] }
   0x6   :  { %295 = vmatprep.subr.mxu1 %v673_v7  ;;  %221 = vmatpush1.msra.mxu0 %v180_v8  ;;  %v503_v16 = vld [vmem:[%s845_s0 + $0x38] sm:$0xff]  ;;  %v502_v18 = vld [vmem:[%s845_s0 + $0x30] sm:$0xff]  ;;  %v15_v21 = vld [vmem:[%s847_s2] sm:$0xff] }
   0x7   :  { %296 = vmatpush1.msra.mxu1 %v672_v9  ;;  %254 = vmatprep.mubr.f32.mxu0 %v695_v3  ;;  %v687_v17 = vld [vmem:[%s845_s0 + $0x78] sm:$0xff]  ;;  %v686_v19 = vld [vmem:[%s845_s0 + $0x70] sm:$0xff]  ;;  %v179_v24 = vld [vmem:[%s847_s2 + $0x8] sm:$0xff] }
   0x8   :  { %329 = vmatprep.mubr.f32.mxu1 %v695_v3  ;;  %671 = vmatmul.mubr.msk.f32.vlgmr.msra.gmra.mxu0 %vm23_vm0, %v670_v10  ;;  %v684_v20 = vld [vmem:[%s846_s1 + $0x18] sm:$0xff]  ;;  %v340_v22 = vld [vmem:[%s847_s2 + $0x10] sm:$0xff] }
   0x9   :  { %674 = vmatmul.mubr.msk.f32.vlgmr.msra.gmra.mxu1 %vm23_vm0, %v670_v10  ;;  %381 = vmatprep.subr.mxu0 %v342_v11  ;;  %v501_v25 = vld [vmem:[%s847_s2 + $0x18] sm:$0xff] }
   0xa   :  { %456 = vmatprep.subr.mxu1 %v680_v12  ;;  %382 = vmatpush1.msra.mxu0 %v341_v13 }
   0xb   :  { %457 = vmatpush1.msra.mxu1 %v679_v14  ;;  %415 = vmatprep.mubr.f32.mxu0 %v695_v3 }
   0xc   :  { %490 = vmatprep.mubr.f32.mxu1 %v695_v3  ;;  %678 = vmatmul.mubr.msk.f32.vlgmr.msra.gmra.mxu0 %vm23_vm0, %v677_v15 }
   0xd   :  { %681 = vmatmul.mubr.msk.f32.vlgmr.msra.gmra.mxu1 %vm23_vm0, %v677_v15  ;;  %542 = vmatprep.subr.mxu0 %v503_v16 }
   0xe   :  { %617 = vmatprep.subr.mxu1 %v687_v17  ;;  %543 = vmatpush1.msra.mxu0 %v502_v18 }
   0xf   :  { %618 = vmatpush1.msra.mxu1 %v686_v19  ;;  %576 = vmatprep.mubr.f32.mxu0 %v695_v3 }
  0x10   :  { %651 = vmatprep.mubr.f32.mxu1 %v695_v3  ;;  %685 = vmatmul.mubr.msk.f32.vlgmr.msra.gmra.mxu0 %vm23_vm0, %v684_v20 }
  0x11   :  { %688 = vmatmul.mubr.msk.f32.vlgmr.msra.gmra.mxu1 %vm23_vm0, %v684_v20  ;;  %694 = vset.pattern.permute.xlu1 %v696_v23 }
  0x12   :  { %20 = vperm.xlu0 %693, %v15_v21   ;;  %345 = vperm.xlu1 %694, %v340_v22  }
  0x16   :  { %184 = vperm.xlu0 %693, %v179_v24   ;;  %506 = vperm.xlu1 %694, %v501_v25  }
  0x8d   :  { %v21_v26 = vpop.permute.xlu0 %20  ;;  %v346_v40 = vpop.permute.xlu1 %345 }
  0x91   :  { %v185_v31 = vpop.permute.xlu0 %184  ;;  %v507_v53 = vpop.permute.xlu1 %506 }
  0xc4   :  { %v93_v27 = vpop.f32.mrf.mxu0 }
  0xc5   :  { %v169_v28 = vpop.f32.mrf.mxu1  ;;  %v94_v29 = vadd.f32 %v93_v27, %v21_v26 }
  0xc6   :  { %v170_v30 = vadd.f32 %v169_v28, %v21_v26  ;;  %v95_v32 = vpop.f32.mrf.mxu0 }
  0xc7   :  { %v171_v33 = vpop.f32.mrf.mxu1  ;;  %98 = vst [vmem:[%s848_s3] sm:$0xff] %v94_v29  ;;  %v96_v34 = vadd.f32 %v95_v32, %v21_v26 }
  0xc8   :  { %668 = vst [vmem:[%s848_s3 + $0x40] sm:$0xff] %v170_v30  ;;  %v172_v35 = vadd.f32 %v171_v33, %v21_v26  ;;  %v256_v36 = vpop.f32.mrf.mxu0 }
  0xc9   :  { %v331_v37 = vpop.f32.mrf.mxu1  ;;  %99 = vst [vmem:[%s848_s3 + $0x8] sm:$0xff] %v96_v34  ;;  %v257_v38 = vadd.f32 %v256_v36, %v185_v31 }
  0xca   :  { %669 = vst [vmem:[%s848_s3 + $0x48] sm:$0xff] %v172_v35  ;;  %v332_v39 = vadd.f32 %v331_v37, %v185_v31  ;;  %v258_v41 = vpop.f32.mrf.mxu0 }
  0xcb   :  { %v333_v42 = vpop.f32.mrf.mxu1  ;;  %261 = vst [vmem:[%s848_s3 + $0x10] sm:$0xff] %v257_v38  ;;  %v259_v43 = vadd.f32 %v258_v41, %v185_v31 }
  0xcc   :  { %675 = vst [vmem:[%s848_s3 + $0x50] sm:$0xff] %v332_v39  ;;  %v334_v44 = vadd.f32 %v333_v42, %v185_v31  ;;  %v417_v45 = vpop.f32.mrf.mxu0 }
  0xcd   :  { %v492_v46 = vpop.f32.mrf.mxu1  ;;  %262 = vst [vmem:[%s848_s3 + $0x18] sm:$0xff] %v259_v43  ;;  %v418_v47 = vadd.f32 %v417_v45, %v346_v40 }
  0xce   :  { %676 = vst [vmem:[%s848_s3 + $0x58] sm:$0xff] %v334_v44  ;;  %v493_v48 = vadd.f32 %v492_v46, %v346_v40  ;;  %v419_v49 = vpop.f32.mrf.mxu0 }
  0xcf   :  { %v494_v50 = vpop.f32.mrf.mxu1  ;;  %422 = vst [vmem:[%s848_s3 + $0x20] sm:$0xff] %v418_v47  ;;  %v420_v51 = vadd.f32 %v419_v49, %v346_v40 }
  0xd0   :  { %682 = vst [vmem:[%s848_s3 + $0x60] sm:$0xff] %v493_v48  ;;  %v495_v52 = vadd.f32 %v494_v50, %v346_v40  ;;  %v578_v54 = vpop.f32.mrf.mxu0 }
  0xd1   :  { %v653_v55 = vpop.f32.mrf.mxu1  ;;  %423 = vst [vmem:[%s848_s3 + $0x28] sm:$0xff] %v420_v51  ;;  %v579_v56 = vadd.f32 %v578_v54, %v507_v53 }
  0xd2   :  { %683 = vst [vmem:[%s848_s3 + $0x68] sm:$0xff] %v495_v52  ;;  %v654_v57 = vadd.f32 %v653_v55, %v507_v53  ;;  %v580_v58 = vpop.f32.mrf.mxu0 }
  0xd3   :  { %v655_v59 = vpop.f32.mrf.mxu1  ;;  %583 = vst [vmem:[%s848_s3 + $0x30] sm:$0xff] %v579_v56  ;;  %v581_v60 = vadd.f32 %v580_v58, %v507_v53 }
  0xd4   :  { %689 = vst [vmem:[%s848_s3 + $0x70] sm:$0xff] %v654_v57  ;;  %v656_v61 = vadd.f32 %v655_v59, %v507_v53 }
  0xd5   :  { %584 = vst [vmem:[%s848_s3 + $0x38] sm:$0xff] %v581_v60 }
  0xd6   :  { %690 = vst [vmem:[%s848_s3 + $0x78] sm:$0xff] %v656_v61 }

</bundles_post_ra>
